<compile_context>
chip_gen: v7x
topology: tpu7x:2x2x1
jax: 0.10.0
libtpu: 0.0.40
codegen_flags: <defaults>
</compile_context>

<pallas_src>
import functools

import jax
import jax.numpy as jnp
from jax.experimental import pallas as pl
from jax.experimental.pallas import tpu as pltpu


# ---------------------------------------------------------------------------
# Registry keys (mirrors REGISTRY_KEYS in the reference code base)
# ---------------------------------------------------------------------------
class REGISTRY_KEYS:
    X_KEY = "X"
    Y_INS_KEY = "y_instance"
    OUTPUT_EMBEDDING = "output_embedding"
    OUTPUT_PREDICTION = "output_prediction"


# ---------------------------------------------------------------------------
# Helpers
# ---------------------------------------------------------------------------
def _round_up(n, m):
    return ((n + m - 1) // m) * m


def _pad2d(a, rows, cols):
    pr, pc = rows - a.shape[0], cols - a.shape[1]
    if pr or pc:
        a = jnp.pad(a, ((0, pr), (0, pc)))
    return a


_VMEM_CEILING = None


def _vmem_ceiling():
    """~80% of per-core VMEM capacity (headroom for compiler scratch)."""
    global _VMEM_CEILING
    if _VMEM_CEILING is None:
        try:
            cap = pltpu.get_tpu_info().vmem_capacity_bytes
        except Exception:
            cap = 64 << 20          # v7x-safe fallback
        _VMEM_CEILING = int(cap * 0.8)
    return _VMEM_CEILING


def _choose_tb(B, block_b):
    """Pick a batch tile: multiple of 16, >=2 grid steps when possible,
    limited over-padding."""
    B_align = _round_up(B, 16)
    tb = min(_round_up(block_b, 16), B_align)
    # v7x megacore: prefer >=2 batch tiles when the batch allows it.
    if B_align // tb < 2 and B_align >= 32:
        tb = _round_up(B_align // 2, 16)
    # Limit batch over-padding (wasted MXU work and x/o DMA).
    while tb > 16 and (_round_up(B, tb) - B) > max(B // 8, 16):
        tb = max(16, _round_up(tb // 2, 16))
    return tb, _round_up(B, tb)


# ---------------------------------------------------------------------------
# Pallas kernel: fused 2-layer MLP (GenePredictor hot path)
# ---------------------------------------------------------------------------
def _gene_predictor_kernel(x_ref, w1_ref, b1_ref, w2_ref, b2_ref, o_ref):
    # x_ref : (TB, D_in_p) f32      w1_ref: (D_in_p, H_p) bf16   b1_ref: (1, H_p) f32
    # w2_ref: (H_p, D_out_p) bf16   b2_ref: (1, D_out_p) f32     o_ref : (TB, D_out_p) f32
    x = x_ref[...].astype(jnp.bfloat16)                      # in-VMEM cast (free under MXU)
    h = jnp.dot(x, w1_ref[...],
                preferred_element_type=jnp.float32)          # MXU, f32 accumulate
    h = jnp.maximum(h + b1_ref[...], 0.0)                    # bias + ReLU in f32 (v5e-safe VPU)
    o = jnp.dot(h.astype(jnp.bfloat16), w2_ref[...],
                preferred_element_type=jnp.float32)          # MXU, f32 accumulate
    o_ref[...] = (o + b2_ref[...]).astype(o_ref.dtype)       # lane-dense full vst


def gene_predictor_forward(x, w1p, b1p, w2p, b2p, *, out_dim, block_b=512):
    """Fused MLP forward.

    `w1p/b1p/w2p/b2p` are already lane-dense padded (bf16 weights / f32 biases,
    prepared once at model init).  x is padded here (fused under jit), streamed
    in f32 and cast to bf16 inside the kernel.  Returns (B, out_dim) f32.
    """
    B, D_in = x.shape
    D_in_p, H_p = w1p.shape
    D_out_p = w2p.shape[1]

    TB, B_p = _choose_tb(B, block_b)
    xp = _pad2d(x, B_p, D_in_p).astype(jnp.float32)

    grid = (B_p // TB,)

    flops = 2 * B_p * (D_in_p * H_p + H_p * D_out_p)
    bytes_accessed = (xp.size * 4 + w1p.size * 2 + w2p.size * 2
                      + b1p.size * 4 + b2p.size * 4 + B_p * D_out_p * 4)

    # VMEM budget: double-buffered x/o tiles, single-buffered resident weights,
    # plus in-kernel intermediates (bf16 x copy, f32 h + its bf16 copy) + slack.
    vmem_need = (
        2 * TB * D_in_p * 4                       # x tile (f32, double-buffered)
        + 2 * TB * D_out_p * 4                    # out tile (f32, double-buffered)
        + TB * D_in_p * 2                         # bf16 copy of x
        + TB * H_p * (4 + 2)                      # h (f32) + bf16 copy
        + (D_in_p * H_p + H_p * D_out_p) * 2      # resident weights (Buffered(1))
        + 8 * (H_p + D_out_p) * 4                 # biases (sublane-padded)
        + (4 << 20)                               # compiler scratch slack
    )
    vmem_limit = int(min(max(vmem_need, 16 << 20), _vmem_ceiling()))

    resident = functools.partial(pl.BlockSpec, pipeline_mode=pl.Buffered(1))

    out_p = pl.pallas_call(
        _gene_predictor_kernel,
        out_shape=jax.ShapeDtypeStruct((B_p, D_out_p), jnp.float32),
        grid_spec=pltpu.PrefetchScalarGridSpec(
            num_scalar_prefetch=0,
            grid=grid,
            in_specs=[
                pl.BlockSpec((TB, D_in_p), lambda i: (i, 0)),       # x: batch-tiled
                resident((D_in_p, H_p), lambda i: (0, 0)),          # w1: resident, 1-buffered
                resident((1, H_p), lambda i: (0, 0)),               # b1: resident
                resident((H_p, D_out_p), lambda i: (0, 0)),         # w2: resident
                resident((1, D_out_p), lambda i: (0, 0)),           # b2: resident
            ],
            out_specs=pl.BlockSpec((TB, D_out_p), lambda i: (i, 0)),
        ),
        compiler_params=pltpu.CompilerParams(
            dimension_semantics=("parallel",),
            vmem_limit_bytes=vmem_limit,
        ),
        cost_estimate=pl.CostEstimate(
            flops=flops, transcendentals=0, bytes_accessed=bytes_accessed),
    )(xp, w1p, b1p, w2p, b2p)

    return out_p[:B, :out_dim]


# ---------------------------------------------------------------------------
# SupervisedModel (JAX / Pallas version)
# ---------------------------------------------------------------------------
def _mse_loss(pred, target):
    return jnp.mean((pred - target) ** 2)


loss_dict = {"mse": _mse_loss}


class SupervisedModel:
    def __init__(self, predictor_config, criterion):
        input_dim = predictor_config["input_dim"]
        hidden_dim = predictor_config["hidden_dim"]
        output_dim = predictor_config["output_dim"]
        self.output_dim = output_dim

        assert criterion in loss_dict.keys(), (
            f"criterion must be in {list(loss_dict.keys())}, got {criterion}."
        )
        self.criterion = loss_dict[criterion]

        # Deterministic parameter init (synthetic weights, no checkpoint).
        key = jax.random.PRNGKey(42)
        k1, k2 = jax.random.split(key)
        s1 = 1.0 / jnp.sqrt(jnp.float32(input_dim))
        s2 = 1.0 / jnp.sqrt(jnp.float32(hidden_dim))
        self.w1 = jax.random.uniform(
            k1, (input_dim, hidden_dim), jnp.float32, -s1, s1)
        self.b1 = jnp.zeros((1, hidden_dim), jnp.float32)
        self.w2 = jax.random.uniform(
            k2, (hidden_dim, output_dim), jnp.float32, -s2, s2)
        self.b2 = jnp.zeros((1, output_dim), jnp.float32)

        # One-time lane-dense padding + bf16 weight cast (hoisted out of the
        # per-call path per perf review).
        d_in_p = _round_up(input_dim, 128)
        h_p = _round_up(hidden_dim, 128)
        d_out_p = _round_up(output_dim, 128)
        self.w1p = _pad2d(self.w1, d_in_p, h_p).astype(jnp.bfloat16)
        self.b1p = _pad2d(self.b1, 1, h_p).astype(jnp.float32)
        self.w2p = _pad2d(self.w2, h_p, d_out_p).astype(jnp.bfloat16)
        self.b2p = _pad2d(self.b2, 1, d_out_p).astype(jnp.float32)

        # Jitted forward so the x pad + output slice fuse with the kernel call.
        self._predict = jax.jit(
            gene_predictor_forward, static_argnames=("out_dim", "block_b"))

    def gene_predictor(self, batch_data):
        x = batch_data[REGISTRY_KEYS.OUTPUT_EMBEDDING]     # (B, D_in)
        pred = self._predict(x, self.w1p, self.b1p, self.w2p, self.b2p,
                             out_dim=self.output_dim)
        batch_data[REGISTRY_KEYS.OUTPUT_PREDICTION] = pred
        return batch_data

    def loss(self, output_dict, batch_data):
        return self.criterion(
            output_dict[REGISTRY_KEYS.OUTPUT_PREDICTION],
            batch_data[REGISTRY_KEYS.Y_INS_KEY],
        )

    def forward(self, batch_data):
        # Mirror the PyTorch module exactly: embedding <- X, then predictor.
        batch_data[REGISTRY_KEYS.OUTPUT_EMBEDDING] = batch_data[REGISTRY_KEYS.X_KEY]
        return self.gene_predictor(batch_data)


# ---------------------------------------------------------------------------
# Main
# ---------------------------------------------------------------------------
if __name__ == "__main__":
    B, D_IN, H, D_OUT = 8, 32, 64, 16

    key = jax.random.PRNGKey(0)
    kx, ky = jax.random.split(key)
    x = jax.random.normal(kx, (B, D_IN), jnp.float32)
    y = jax.random.normal(ky, (B, D_OUT), jnp.float32)

    model = SupervisedModel(
        predictor_config={"input_dim": D_IN, "hidden_dim": H, "output_dim": D_OUT},
        criterion="mse",
    )

    batch_data = {REGISTRY_KEYS.X_KEY: x, REGISTRY_KEYS.Y_INS_KEY: y}
    out_dict = model.forward(batch_data)
    pred = out_dict[REGISTRY_KEYS.OUTPUT_PREDICTION]
    jax.block_until_ready(pred)

    # Cross-check against a plain-JAX reference with the same bf16 operand
    # casts (kernel casts x / h to bf16 for the MXU, accumulates in f32).
    xb = x.astype(jnp.bfloat16).astype(jnp.float32)
    w1b = model.w1.astype(jnp.bfloat16).astype(jnp.float32)
    w2b = model.w2.astype(jnp.bfloat16).astype(jnp.float32)
    h_ref = jnp.maximum(xb @ w1b + model.b1, 0.0)
    ref = h_ref.astype(jnp.bfloat16).astype(jnp.float32) @ w2b + model.b2

    assert pred.shape == (B, D_OUT)
    assert jnp.allclose(pred, ref, atol=5e-3, rtol=5e-3)

    # Exercise the loss path once as well.
    loss_val = model.loss(out_dict, batch_data)
    jax.block_until_ready(loss_val)

    print("KERNEL_OK")
</pallas_src>

<mosaic_0001>
module attributes {stable_mosaic.version = 11 : i64} {
  func.func @_gene_predictor_kernel(%arg0: i32, %arg1: memref<16x128xf32, #tpu.memory_space<vmem>>, %arg2: memref<128x128xbf16, #tpu.memory_space<vmem>>, %arg3: memref<1x128xf32, #tpu.memory_space<vmem>>, %arg4: memref<128x128xbf16, #tpu.memory_space<vmem>>, %arg5: memref<1x128xf32, #tpu.memory_space<vmem>>, %arg6: memref<16x128xf32, #tpu.memory_space<vmem>>) attributes {dimension_semantics = [#tpu.dimension_semantics<parallel>], iteration_bounds = array<i64: 1>, scalar_prefetch = 0 : i64, scratch_operands = 0 : i64, tpu.core_type = #tpu.core_type<tc>, window_params = [{transform_indices = @transform_0, window_bounds = array<i64: 16, 128>}, {pipeline_mode = #tpu.pipeline_mode<synchronous>, transform_indices = @transform_1, window_bounds = array<i64: 128, 128>}, {pipeline_mode = #tpu.pipeline_mode<synchronous>, transform_indices = @transform_2, window_bounds = array<i64: 1, 128>}, {pipeline_mode = #tpu.pipeline_mode<synchronous>, transform_indices = @transform_3, window_bounds = array<i64: 128, 128>}, {pipeline_mode = #tpu.pipeline_mode<synchronous>, transform_indices = @transform_4, window_bounds = array<i64: 1, 128>}, {transform_indices = @transform_5, window_bounds = array<i64: 16, 128>}]} {
    %c0 = arith.constant 0 : index
    %c0_0 = arith.constant 0 : index
    %0 = vector.load %arg1[%c0, %c0_0] : memref<16x128xf32, #tpu.memory_space<vmem>>, vector<16x128xf32>
    %1 = arith.truncf %0 : vector<16x128xf32> to vector<16x128xbf16>
    %c0_1 = arith.constant 0 : index
    %c0_2 = arith.constant 0 : index
    %2 = vector.load %arg2[%c0_1, %c0_2] : memref<128x128xbf16, #tpu.memory_space<vmem>>, vector<128x128xbf16>
    %cst = arith.constant dense<0.000000e+00> : vector<16x128xf32>
    %3 = tpu.matmul %1, %2, %cst {dimension_numbers = #tpu.dot_dimension_numbers<[1], [0], [0], [1], [0, 0, 1, 1], [], []>} : vector<16x128xbf16>, vector<128x128xbf16>, vector<16x128xf32> -> vector<16x128xf32>
    %c0_3 = arith.constant 0 : index
    %c0_4 = arith.constant 0 : index
    %4 = vector.load %arg3[%c0_3, %c0_4] : memref<1x128xf32, #tpu.memory_space<vmem>>, vector<1x128xf32>
    %5 = vector.broadcast %4 : vector<1x128xf32> to vector<16x128xf32>
    %6 = arith.addf %3, %5 : vector<16x128xf32>
    %cst_5 = arith.constant 0.000000e+00 : f32
    %7 = vector.broadcast %cst_5 : f32 to vector<16x128xf32>
    %8 = arith.maximumf %6, %7 : vector<16x128xf32>
    %9 = arith.truncf %8 : vector<16x128xf32> to vector<16x128xbf16>
    %c0_6 = arith.constant 0 : index
    %c0_7 = arith.constant 0 : index
    %10 = vector.load %arg4[%c0_6, %c0_7] : memref<128x128xbf16, #tpu.memory_space<vmem>>, vector<128x128xbf16>
    %cst_8 = arith.constant dense<0.000000e+00> : vector<16x128xf32>
    %11 = tpu.matmul %9, %10, %cst_8 {dimension_numbers = #tpu.dot_dimension_numbers<[1], [0], [0], [1], [0, 0, 1, 1], [], []>} : vector<16x128xbf16>, vector<128x128xbf16>, vector<16x128xf32> -> vector<16x128xf32>
    %c0_9 = arith.constant 0 : index
    %c0_10 = arith.constant 0 : index
    %12 = vector.load %arg5[%c0_9, %c0_10] : memref<1x128xf32, #tpu.memory_space<vmem>>, vector<1x128xf32>
    %13 = vector.broadcast %12 : vector<1x128xf32> to vector<16x128xf32>
    %14 = arith.addf %11, %13 : vector<16x128xf32>
    %c0_11 = arith.constant 0 : index
    %c0_12 = arith.constant 0 : index
    %15 = vector.load %arg6[%c0_11, %c0_12] : memref<16x128xf32, #tpu.memory_space<vmem>>, vector<16x128xf32>
    tpu.vector_store %arg6[%c0_11, %c0_12], %14 {strides = array<i32>} : memref<16x128xf32, #tpu.memory_space<vmem>>, vector<16x128xf32>,
    return
  }
  func.func @transform_0(%arg0: i32) -> (i32, i32) {
    %c0_i32 = arith.constant 0 : i32
    %c0_i32_0 = arith.constant 0 : i32
    return %arg0, %c0_i32 : i32, i32
  }
  func.func @transform_1(%arg0: i32) -> (i32, i32) {
    %c0_i32 = arith.constant 0 : i32
    %c0_i32_0 = arith.constant 0 : i32
    %c0_i32_1 = arith.constant 0 : i32
    return %c0_i32, %c0_i32_0 : i32, i32
  }
  func.func @transform_2(%arg0: i32) -> (i32, i32) {
    %c0_i32 = arith.constant 0 : i32
    %c0_i32_0 = arith.constant 0 : i32
    %c0_i32_1 = arith.constant 0 : i32
    return %c0_i32, %c0_i32_0 : i32, i32
  }
  func.func @transform_3(%arg0: i32) -> (i32, i32) {
    %c0_i32 = arith.constant 0 : i32
    %c0_i32_0 = arith.constant 0 : i32
    %c0_i32_1 = arith.constant 0 : i32
    return %c0_i32, %c0_i32_0 : i32, i32
  }
  func.func @transform_4(%arg0: i32) -> (i32, i32) {
    %c0_i32 = arith.constant 0 : i32
    %c0_i32_0 = arith.constant 0 : i32
    %c0_i32_1 = arith.constant 0 : i32
    return %c0_i32, %c0_i32_0 : i32, i32
  }
  func.func @transform_5(%arg0: i32) -> (i32, i32) {
    %c0_i32 = arith.constant 0 : i32
    %c0_i32_0 = arith.constant 0 : i32
    return %arg0, %c0_i32 : i32, i32
  }
}

</mosaic_0001>

<bundles_post_ra>
// kernel: gene_predictor_forward.1
= control target key start
LH: loop header
LB: loop body
LE: loop exit
PB: predicated region body
PF: predicated region fallthrough
CT: control target
= control target key end

     0   :  { %10 = vsyncpa [#allocation3], 0  ;;  %s511_s0 = inlined_call_operand.vmem [shape: f32[16,128], index: 0, kind: input, shape index: {}]   ;;  %s512_s1 = inlined_call_operand.hbm [shape: bf16[128,128], index: 1, kind: input, shape index: {}]   ;;  %s513_s2 = inlined_call_operand.vmem [shape: f32[1,128], index: 2, kind: input, shape index: {}]   ;;  %s514_s3 = inlined_call_operand.hbm [shape: bf16[128,128], index: 3, kind: input, shape index: {}]   ;;  %s515_s4 = inlined_call_operand.vmem [shape: f32[1,128], index: 4, kind: input, shape index: {}]   ;;  %s516_s5 = inlined_call_operand.vmem [shape: f32[16,128], index: 5, kind: output, shape index: {}]  }
   0x1   :  { %11 = vsyncpa [#allocation5], 0  ;;  %s433_s18 = smov [#allocation2]   ;;  %s385_s22 = scalar_lea.hbm %s512_s1, 1024 }
   0x2   :  { %s19_s19 = sshll.u32 %s433_s18, 4  ;;  %p386_p0 = scmp.ne.s32.totalorder %s512_s1, %s385_s22  ;;  %s20_s19 = int_to_ptr.vmem [resolvable:$true] %s19_s19 }
   0x3   :  { %p389_p1 = scmp.lt.u32.totalorder %s385_s22, %s512_s1 }
   0x5   :  { %p391_p2 = pnand %p389_p1, %p386_p0 }
   0x7   :  { %394 = shalt.err (!%p391_p2)
}
   0x8   :  { %s395_s27 = scalar_lea.vmem %s20_s19, 1024  ;;  %p400_p4 = scmp.lt.s32.totalorder %s20_s19, %s20_s19 }
   0x9   :  { %p396_p3 = scmp.ne.s32.totalorder %s20_s19, %s395_s27  ;;  %p401_p5 = scmp.lt.s32.totalorder %s395_s27, %s395_s27 }
   0xb   :  { %p402_p6 = por %p401_p5, %p400_p4 }
   0xd   :  { %p403_p7 = pnand %p402_p6, %p396_p3 }
   0xf   :  { %406 = shalt.err (!%p403_p7)
}
  0x10   :  { %s434_s28 = smov 64   ;;  %s435_s29 = smov 4  }
  0x11   :  { %25 = dma.hbm_to_vmem [thread:$0]  %s512_s1, 1024, %s20_s19, [#allocation3], %s434_s28, %s434_s28, %s435_s29  }
  0x12   :  { %s436_s7 = smov [#allocation4]   ;;  %s407_s11 = scalar_lea.hbm %s514_s3, 1024 }
  0x13   :  { %s33_s8 = sshll.u32 %s436_s7, 4  ;;  %p408_p8 = scmp.ne.s32.totalorder %s514_s3, %s407_s11  ;;  %s34_s8 = int_to_ptr.vmem [resolvable:$true] %s33_s8 }
  0x14   :  { %p411_p9 = scmp.lt.u32.totalorder %s407_s11, %s514_s3 }
  0x16   :  { %p413_p10 = pnand %p411_p9, %p408_p8 }
  0x18   :  { %416 = shalt.err (!%p413_p10)
}
  0x19   :  { %s417_s16 = scalar_lea.vmem %s34_s8, 1024  ;;  %p422_p12 = scmp.lt.s32.totalorder %s34_s8, %s34_s8 }
  0x1a   :  { %p418_p11 = scmp.ne.s32.totalorder %s34_s8, %s417_s16  ;;  %p423_p13 = scmp.lt.s32.totalorder %s417_s16, %s417_s16 }
  0x1c   :  { %p424_p0 = por %p423_p13, %p422_p12 }
  0x1e   :  { %p425_p1 = pnand %p424_p0, %p418_p11 }
  0x20   :  { %428 = shalt.err (!%p425_p1)
}
  0x21   :  { %39 = dma.hbm_to_vmem [thread:$0]  %s514_s3, 1024, %s34_s8, [#allocation5], %s434_s28, %s434_s28, %s435_s29  }
  0x22   :  { %429 = dma.done.wait [#allocation3], 1024  }
  0x23   :  { %430 = vsyncadd [#allocation3], 4294966272 }
  0x24   :  { %431 = dma.done.wait [#allocation5], 1024  }
  0x25   :  { %432 = vsyncadd [#allocation5], 4294966272  ;;  %v437_v0 = vmov 0.0   ;;  %vm438_vm0 = vmmov 0   ;;  %v369_v1 = vld [vmem:[#allocation2] sm:$0xff]   ;;  %v370_v2 = vld [vmem:[#allocation2 + $0x8] sm:$0xff]  }
  0x26   :  { %323 = vmatprep.subr.bf16.mxu0 %v437_v0  ;;  %339 = vmatprep.mubr.msk.bf16.mxu0 %vm438_vm0, %v437_v0  ;;  %v371_v3 = vld [vmem:[#allocation2 + $0x10] sm:$0xff]   ;;  %v377_v4 = vld [vmem:[#allocation4] sm:$0xff]   ;;  %v372_v5 = vld [vmem:[#allocation2 + $0x18] sm:$0xff]  }
  0x27   :  { %343 = vmatprep.subr.bf16.mxu1 %v437_v0  ;;  %359 = vmatprep.mubr.msk.bf16.mxu1 %vm438_vm0, %v437_v0  ;;  %v378_v6 = vld [vmem:[#allocation4 + $0x8] sm:$0xff]   ;;  %v373_v7 = vld [vmem:[#allocation2 + $0x20] sm:$0xff]   ;;  %v379_v8 = vld [vmem:[#allocation4 + $0x10] sm:$0xff]  }
  0x28   :  { %324 = vmatpush3.bf16.msra.mxu0 %v369_v1  ;;  %344 = vmatpush3.bf16.msra.mxu1 %v377_v4  ;;  %v374_v9 = vld [vmem:[#allocation2 + $0x28] sm:$0xff]   ;;  %v380_v10 = vld [vmem:[#allocation4 + $0x18] sm:$0xff]   ;;  %v375_v11 = vld [vmem:[#allocation2 + $0x30] sm:$0xff]  }
  0x29   :  { %325 = vmatprep.subr.bf16.mxu0 %v437_v0  ;;  %345 = vmatprep.subr.bf16.mxu1 %v437_v0  ;;  %v381_v12 = vld [vmem:[#allocation4 + $0x20] sm:$0xff]   ;;  %v376_v13 = vld [vmem:[#allocation2 + $0x38] sm:$0xff]   ;;  %v50_v15 = vld [vmem:[%s511_s0 + $0x8] sm:$0xff] }
  0x2a   :  { %v49_v14 = vld [vmem:[%s511_s0] sm:$0xff]  ;;  %v382_v16 = vld [vmem:[#allocation4 + $0x28] sm:$0xff]   ;;  %v383_v18 = vld [vmem:[#allocation4 + $0x30] sm:$0xff]  }
  0x2b   :  { %v51_v17 = vpack.c.bf16 %v50_v15, %v49_v14  ;;  %v384_v19 = vld [vmem:[#allocation4 + $0x38] sm:$0xff]   ;;  %v287_v20 = vld [vmem:[%s513_s2] ss:$0 sm:$0xff] }
  0x2c   :  { %326 = vmatpush3.bf16.msra.mxu0 %v370_v2  ;;  %346 = vmatpush3.bf16.msra.mxu1 %v378_v6  ;;  %v296_v30 = vld [vmem:[%s515_s4] ss:$0 sm:$0xff] }
  0x2d   :  { %327 = vmatprep.subr.bf16.mxu0 %v437_v0  ;;  %347 = vmatprep.subr.bf16.mxu1 %v437_v0 }
  0x30   :  { %328 = vmatpush3.bf16.msra.mxu0 %v371_v3  ;;  %348 = vmatpush3.bf16.msra.mxu1 %v379_v8 }
  0x31   :  { %329 = vmatprep.subr.bf16.mxu0 %v437_v0  ;;  %349 = vmatprep.subr.bf16.mxu1 %v437_v0 }
  0x34   :  { %330 = vmatpush3.bf16.msra.mxu0 %v372_v5  ;;  %350 = vmatpush3.bf16.msra.mxu1 %v380_v10 }
  0x35   :  { %331 = vmatprep.subr.bf16.mxu0 %v437_v0  ;;  %351 = vmatprep.subr.bf16.mxu1 %v437_v0 }
  0x38   :  { %332 = vmatpush3.bf16.msra.mxu0 %v373_v7  ;;  %352 = vmatpush3.bf16.msra.mxu1 %v381_v12 }
  0x39   :  { %333 = vmatprep.subr.bf16.mxu0 %v437_v0  ;;  %353 = vmatprep.subr.bf16.mxu1 %v437_v0 }
  0x3c   :  { %334 = vmatpush3.bf16.msra.mxu0 %v374_v9  ;;  %354 = vmatpush3.bf16.msra.mxu1 %v382_v16 }
  0x3d   :  { %335 = vmatprep.subr.bf16.mxu0 %v437_v0  ;;  %355 = vmatprep.subr.bf16.mxu1 %v437_v0 }
  0x40   :  { %336 = vmatpush3.bf16.msra.mxu0 %v375_v11  ;;  %356 = vmatpush3.bf16.msra.mxu1 %v383_v18 }
  0x41   :  { %337 = vmatprep.subr.bf16.mxu0 %v437_v0  ;;  %357 = vmatprep.subr.bf16.mxu1 %v437_v0 }
  0x44   :  { %338 = vmatpush3.bf16.msra.mxu0 %v376_v13  ;;  %358 = vmatpush3.bf16.msra.mxu1 %v384_v19 }
  0x47   :  { %340 = vmatmul.mubr.bf16.vlgmr.msra.gmra.mrb[0].mxu0 %v51_v17 }
 0x11a   :  { %v157_v21 = vpop.f32.mrb[0].mxu0 }
 0x11b   :  { %v158_v22 = vadd.f32 %v287_v20, %v157_v21  ;;  %v341_v23 = vpop.f32.mrb[1].mxu0 }
 0x11c   :  { %v160_v24 = vpop.f32.mrb[2].mxu0 }
 0x11d   :  { %v161_v25 = vadd.f32 %v287_v20, %v160_v24  ;;  %v342_v26 = vpop.f32.mrb[3].mxu0  ;;  %v164_v27 = vmax.f32 %v158_v22, 0.0 }
 0x11f   :  { %v165_v28 = vmax.f32 %v161_v25, 0.0 }
 0x121   :  { %v166_v29 = vpack.c.bf16 %v165_v28, %v164_v27 }
 0x123   :  { %360 = vmatmul.mubr.bf16.vlgmr.msra.gmra.mrb[0].mxu1 %v166_v29 }
 0x1f6   :  { %v272_v31 = vpop.f32.mrb[0].mxu1 }
 0x1f7   :  { %v273_v32 = vadd.f32 %v296_v30, %v272_v31  ;;  %v361_v33 = vpop.f32.mrb[1].mxu1 }
 0x1f8   :  { %v275_v34 = vpop.f32.mrb[2].mxu1 }
 0x1f9   :  { %279 = vst [vmem:[%s516_s5] sm:$0xff] %v273_v32  ;;  %v276_v35 = vadd.f32 %v296_v30, %v275_v34  ;;  %v362_v36 = vpop.f32.mrb[3].mxu1 }
 0x1fb   :  { %280 = vst [vmem:[%s516_s5 + $0x8] sm:$0xff] %v276_v35 }
 0x1fc   :  { %285 = vsyncpa [#allocation3], 1 }
 0x1fd   :  { %286 = vsyncpa [#allocation5], 1 }

</bundles_post_ra>
